<compile_context>
chip_gen: v6e
topology: v6e:2x2x1
jax: 0.10.0
libtpu: 0.0.40
codegen_flags: <defaults>
</compile_context>

<pallas_src>
import jax
import jax.numpy as jnp
from jax.experimental import pallas as pl
from jax.experimental.pallas import tpu as pltpu


def _round_up(x, m):
    return ((x + m - 1) // m) * m


def _stacked_embedder_kernel(x_ref, w_ref, b_ref, o_ref):
    # Single fused lane-dense matmul over the pre-concatenated weights.
    # bf16 operands, f32 accumulation on the MXU, f32 bias add on the VPU,
    # single cast at the store.
    acc = jnp.dot(x_ref[...], w_ref[...], preferred_element_type=jnp.float32)
    o_ref[...] = (acc + b_ref[...]).astype(o_ref.dtype)


def stacked_embedder(data, w1, b1, w2, b2, *, tile_m=8192,
                     compute_dtype=jnp.bfloat16):
    """data: [B, S, F]. Returns {'embeddings': [B, S, D1+D2]} in compute_dtype.

    Mirrors StackedEmbedder.forward over two linear sub-embedders:
    cat([data @ w1 + b1, data @ w2 + b2], -1).
    """
    B, S, F = data.shape
    D1 = w1.shape[1]
    D2 = w2.shape[1]
    D = D1 + D2
    M = B * S

    # Fuse the torch.cat into the weights (exact): one matmul writes the
    # already-concatenated output.
    w = jnp.concatenate([w1, w2], axis=1).astype(compute_dtype)            # [F, D]
    b = jnp.concatenate([b1, b2], axis=0).reshape(1, D).astype(jnp.float32)  # [1, D] f32
    x2d = data.reshape(M, F).astype(compute_dtype)                          # [M, F]

    # Row tile: big by default, rounded to the 8-row sublane granule, clamped
    # to the problem size, and clamped so the grid splits >=2 ways when M is
    # large enough (feeds both v7x TensorCores via the "parallel" axis).
    tile_m = _round_up(max(int(tile_m), 8), 8)
    tile_m = min(tile_m, _round_up(M, 8))
    tile_m = min(tile_m, _round_up(pl.cdiv(M, 2), 256))
    tile_m = max(tile_m, 8)
    grid_m = pl.cdiv(M, tile_m)

    itemsize = jnp.dtype(compute_dtype).itemsize
    cost = pl.CostEstimate(
        flops=2 * M * F * D,
        transcendentals=0,
        bytes_accessed=itemsize * (M * F + F * D + M * D) + 4 * D,
    )

    # No wrapper padding / output slicing: Pallas masks the ragged final
    # block's stores; garbage OOB input rows only feed masked output rows.
    out2d = pl.pallas_call(
        _stacked_embedder_kernel,
        out_shape=jax.ShapeDtypeStruct((M, D), compute_dtype),
        grid_spec=pltpu.PrefetchScalarGridSpec(
            num_scalar_prefetch=0,
            grid=(grid_m,),
            in_specs=[
                pl.BlockSpec((tile_m, F), lambda i: (i, 0)),  # data rows
                pl.BlockSpec((F, D), lambda i: (0, 0)),       # fused W (resident)
                pl.BlockSpec((1, D), lambda i: (0, 0)),       # fused bias (f32)
            ],
            out_specs=pl.BlockSpec((tile_m, D), lambda i: (i, 0)),
        ),
        compiler_params=pltpu.CompilerParams(
            dimension_semantics=("parallel",),
            vmem_limit_bytes=32 * 1024 * 1024,  # keeps tile_m=8192 safe on v5e/v7x
        ),
        cost_estimate=cost,
    )(x2d, w, b)

    # TODO(synk): optional pipeline_mode=pl.Buffered(3) on the x BlockSpec for
    # a small (<5%) DMA-jitter win at very large tiles; left at default here.
    return {"embeddings": out2d.reshape(B, S, D)}


if __name__ == "__main__":
    # Small shapes: batch=2, seq=8, features=32, two embedders with dims 64+64.
    B, S, F = 2, 8, 32
    D1, D2 = 64, 64

    key = jax.random.PRNGKey(0)
    k_x, k_w1, k_b1, k_w2, k_b2, k_x2 = jax.random.split(key, 6)

    data = jax.random.normal(k_x, (B, S, F), dtype=jnp.float32)
    w1 = jax.random.normal(k_w1, (F, D1), dtype=jnp.float32) * 0.05
    b1 = jax.random.normal(k_b1, (D1,), dtype=jnp.float32) * 0.05
    w2 = jax.random.normal(k_w2, (F, D2), dtype=jnp.float32) * 0.05
    b2 = jax.random.normal(k_b2, (D2,), dtype=jnp.float32) * 0.05

    out = stacked_embedder(data, w1, b1, w2, b2)
    emb = jax.block_until_ready(out["embeddings"])

    # Pure-JAX f32 reference (mirrors the PyTorch forward: per-embedder linear,
    # cat(-1)). Tolerance accounts for the bf16 input/output quantization.
    ref = jnp.concatenate([data @ w1 + b1, data @ w2 + b2], axis=-1)
    assert emb.shape == (B, S, D1 + D2)
    assert emb.dtype == jnp.bfloat16
    assert jnp.allclose(emb.astype(jnp.float32), ref, atol=3e-2, rtol=3e-2)

    # Ragged / multi-step path: M = 4*37 = 148 rows with a user tile_m that is
    # not a multiple of 8 (rounds 100 -> 104, grid_m = 2, final block partial
    # -> exercises Pallas' masked tail stores without any wrapper pad/slice).
    data_odd = jax.random.normal(k_x2, (4, 37, F), dtype=jnp.float32)
    out_odd = stacked_embedder(data_odd, w1, b1, w2, b2, tile_m=100)
    emb_odd = jax.block_until_ready(out_odd["embeddings"])
    ref_odd = jnp.concatenate([data_odd @ w1 + b1, data_odd @ w2 + b2], axis=-1)
    assert emb_odd.shape == (4, 37, D1 + D2)
    assert jnp.allclose(emb_odd.astype(jnp.float32), ref_odd, atol=3e-2, rtol=3e-2)

    print("KERNEL_OK")
</pallas_src>

<mosaic_0001>
module attributes {stable_mosaic.version = 11 : i64} {
  func.func @_stacked_embedder_kernel(%arg0: i32, %arg1: memref<16x32xbf16, #tpu.memory_space<vmem>>, %arg2: memref<32x128xbf16, #tpu.memory_space<vmem>>, %arg3: memref<1x128xf32, #tpu.memory_space<vmem>>, %arg4: memref<16x128xbf16, #tpu.memory_space<vmem>>) attributes {dimension_semantics = [#tpu.dimension_semantics<parallel>], iteration_bounds = array<i64: 1>, scalar_prefetch = 0 : i64, scratch_operands = 0 : i64, tpu.core_type = #tpu.core_type<tc>, window_params = [{transform_indices = @transform_0, window_bounds = array<i64: 16, 32>}, {pipeline_mode = #tpu.pipeline_mode<synchronous>, transform_indices = @transform_1, window_bounds = array<i64: 32, 128>}, {pipeline_mode = #tpu.pipeline_mode<synchronous>, transform_indices = @transform_2, window_bounds = array<i64: 1, 128>}, {transform_indices = @transform_3, window_bounds = array<i64: 16, 128>}]} {
    %c0 = arith.constant 0 : index
    %c0_0 = arith.constant 0 : index
    %0 = vector.load %arg1[%c0, %c0_0] : memref<16x32xbf16, #tpu.memory_space<vmem>>, vector<16x32xbf16>
    %c0_1 = arith.constant 0 : index
    %c0_2 = arith.constant 0 : index
    %1 = vector.load %arg2[%c0_1, %c0_2] : memref<32x128xbf16, #tpu.memory_space<vmem>>, vector<32x128xbf16>
    %cst = arith.constant dense<0.000000e+00> : vector<16x128xf32>
    %2 = tpu.matmul %0, %1, %cst {dimension_numbers = #tpu.dot_dimension_numbers<[1], [0], [0], [1], [0, 0, 1, 1], [], []>} : vector<16x32xbf16>, vector<32x128xbf16>, vector<16x128xf32> -> vector<16x128xf32>
    %c0_3 = arith.constant 0 : index
    %c0_4 = arith.constant 0 : index
    %3 = vector.load %arg3[%c0_3, %c0_4] : memref<1x128xf32, #tpu.memory_space<vmem>>, vector<1x128xf32>
    %4 = vector.broadcast %3 : vector<1x128xf32> to vector<16x128xf32>
    %5 = arith.addf %2, %4 : vector<16x128xf32>
    %6 = arith.truncf %5 : vector<16x128xf32> to vector<16x128xbf16>
    %c0_5 = arith.constant 0 : index
    %c0_6 = arith.constant 0 : index
    %7 = vector.load %arg4[%c0_5, %c0_6] : memref<16x128xbf16, #tpu.memory_space<vmem>>, vector<16x128xbf16>
    tpu.vector_store %arg4[%c0_5, %c0_6], %6 {strides = array<i32>} : memref<16x128xbf16, #tpu.memory_space<vmem>>, vector<16x128xbf16>,
    return
  }
  func.func @transform_0(%arg0: i32) -> (i32, i32) {
    %c0_i32 = arith.constant 0 : i32
    %c0_i32_0 = arith.constant 0 : i32
    return %arg0, %c0_i32 : i32, i32
  }
  func.func @transform_1(%arg0: i32) -> (i32, i32) {
    %c0_i32 = arith.constant 0 : i32
    %c0_i32_0 = arith.constant 0 : i32
    %c0_i32_1 = arith.constant 0 : i32
    return %c0_i32, %c0_i32_0 : i32, i32
  }
  func.func @transform_2(%arg0: i32) -> (i32, i32) {
    %c0_i32 = arith.constant 0 : i32
    %c0_i32_0 = arith.constant 0 : i32
    %c0_i32_1 = arith.constant 0 : i32
    return %c0_i32, %c0_i32_0 : i32, i32
  }
  func.func @transform_3(%arg0: i32) -> (i32, i32) {
    %c0_i32 = arith.constant 0 : i32
    %c0_i32_0 = arith.constant 0 : i32
    return %arg0, %c0_i32 : i32, i32
  }
}

</mosaic_0001>

<bundles_post_ra>
// kernel: tpu_custom_call.1
= control target key start
LH: loop header
LB: loop body
LE: loop exit
PB: predicated region body
PF: predicated region fallthrough
CT: control target
= control target key end

     0   :  { %8 = vsyncpa [#allocation3], 0  ;;  %s296_s0 = inlined_call_operand.hbm [shape: bf16[16,32], index: 0, kind: input, shape index: {}]   ;;  %s297_s1 = inlined_call_operand.hbm [shape: bf16[32,128], index: 1, kind: input, shape index: {}]   ;;  %s298_s2 = inlined_call_operand.vmem [shape: f32[1,128], index: 2, kind: input, shape index: {}]   ;;  %s299_s3 = inlined_call_operand.hbm [shape: bf16[16,128], index: 3, kind: output, shape index: {}]  }
   0x1   :  { %9 = vsyncpa [#allocation6], 0 }
   0x2   :  { %10 = vsyncpa [#allocation4], 0  ;;  %s248_s12 = smov [#allocation2]  }
   0x3   :  { %s16_s13 = sshll.u32 %s248_s12, 4  ;;  %s17_s13 = int_to_ptr.vmem [resolvable:$true] %s16_s13 }
   0x4   :  { %s190_s14 = scalar_lea.vmem %s17_s13, 128  ;;  %p195_p1 = scmp.lt.s32.totalorder %s17_s13, %s17_s13 }
   0x5   :  { %p191_p0 = scmp.ne.s32.totalorder %s17_s13, %s190_s14  ;;  %p196_p2 = scmp.lt.s32.totalorder %s190_s14, %s190_s14 }
   0x7   :  { %p197_p3 = por %p196_p2, %p195_p1 }
   0x9   :  { %p198_p4 = pnand %p197_p3, %p191_p0 }
   0xb   :  { %201 = shalt.err (!%p198_p4)
}
   0xc   :  { %s249_s15 = smov 64   ;;  %s250_s16 = smov 4  }
   0xd   :  { %22 = dma.hbm_to_vmem [thread:$0]  %s296_s0, 128, %s17_s13, [#allocation3], %s249_s15, %s249_s15, %s250_s16  }
   0xe   :  { %s251_s19 = smov [#allocation5]  }
   0xf   :  { %s28_s20 = sshll.u32 %s251_s19, 4  ;;  %s29_s20 = int_to_ptr.vmem [resolvable:$true] %s28_s20 }
  0x10   :  { %s210_s21 = scalar_lea.vmem %s29_s20, 256  ;;  %p215_p6 = scmp.lt.s32.totalorder %s29_s20, %s29_s20 }
  0x11   :  { %p211_p5 = scmp.ne.s32.totalorder %s29_s20, %s210_s21  ;;  %p216_p7 = scmp.lt.s32.totalorder %s210_s21, %s210_s21 }
  0x13   :  { %p217_p8 = por %p216_p7, %p215_p6 }
  0x15   :  { %p218_p9 = pnand %p217_p8, %p211_p5 }
  0x17   :  { %221 = shalt.err (!%p218_p9)
}
  0x18   :  { %34 = dma.hbm_to_vmem [thread:$0]  %s297_s1, 256, %s29_s20, [#allocation6], %s249_s15, %s249_s15, %s250_s16  }
  0x19   :  { %242 = dma.done.wait [#allocation3], 128  }
  0x1a   :  { %243 = vsyncadd [#allocation3], 4294967168 }
  0x1b   :  { %244 = dma.done.wait [#allocation6], 256  }
  0x1c   :  { %245 = vsyncadd [#allocation6], 4294967040  ;;  %v252_v0 = vmov 0.0   ;;  %vm253_vm0 = vmmov 0   ;;  %v179_v1 = vld [vmem:[#allocation5 + $0x8] sm:$0xff]   ;;  %v180_v2 = vld [vmem:[#allocation5] sm:$0xff]  }
  0x1d   :  { %164 = vmatprep.subr.bf16.mxu0 %v252_v0  ;;  %168 = vmatprep.mubr.msk.bf16.mxu0 %vm253_vm0, %v252_v0  ;;  %v181_v3 = vld [vmem:[#allocation2] sm:$0xff]   ;;  %vm74_vm1 = vcmask 261120   ;;  %s254_s1 = smov [#allocation7]  }
  0x1e   :  { %165 = vmatpush3.bf16.msra.mxu0 %v179_v1  ;;  %v147_v5 = vld [vmem:[%s298_s2] ss:$0 sm:$0xff]  ;;  %s134_s25 = sshll.u32 %s254_s1, 4  ;;  %s135_s25 = int_to_ptr.vmem [resolvable:$true] %s134_s25 }
  0x1f   :  { %166 = vmatprep.subr.bf16.mxu0 %v252_v0  ;;  %s222_s26 = scalar_lea.vmem %s135_s25, 128  ;;  %p227_p11 = scmp.lt.s32.totalorder %s135_s25, %s135_s25 }
  0x20   :  { %p223_p10 = scmp.ne.s32.totalorder %s135_s25, %s222_s26  ;;  %p228_p12 = scmp.lt.s32.totalorder %s222_s26, %s222_s26 }
  0x22   :  { %167 = vmatpush3.bf16.msra.mxu0 %v180_v2  ;;  %p229_p13 = por %p228_p12, %p227_p11 }
  0x24   :  { %p230_p0 = pnand %p229_p13, %p223_p10 }
  0x25   :  { %169 = vmatmul.mubr.msk.bf16.vlgmr.msra.gmra.mxu0 %vm74_vm1, %v181_v3 }
  0xe5   :  { %v112_v4 = vpop.f32.mrf.mxu0 }
  0xe6   :  { %v113_v8 = vadd.f32 %v147_v5, %v112_v4 }
  0xe7   :  { %v170_v6 = vpop.f32.mrf.mxu0 }
  0xe9   :  { %v115_v7 = vpop.f32.mrf.mxu0 }
  0xea   :  { %v116_v9 = vadd.f32 %v147_v5, %v115_v7 }
  0xeb   :  { %v171_v10 = vpop.f32.mrf.mxu0 }
  0xec   :  { %v159_v11 = vpack.c.bf16 %v116_v9, %v113_v8 }
  0xee   :  { %160 = vst [vmem:[#allocation7] sm:$0xff] %v159_v11  }
  0xef   :  { %233 = shalt.err (!%p230_p0)
}
  0xf0   :  { %140 = dma.vmem_to_hbm [thread:$0]  %s135_s25, 128, %s299_s3, [#allocation4], %s249_s15, %s249_s15, %s250_s16  }
  0xf1   :  { %246 = dma.done.wait [#allocation4], 128  }
  0xf2   :  { %247 = vsyncadd [#allocation4], 4294967168 }
  0xf3   :  { %144 = vsyncpa [#allocation3], 1 }
  0xf4   :  { %145 = vsyncpa [#allocation6], 1 }
  0xf5   :  { %146 = vsyncpa [#allocation4], 1 }

</bundles_post_ra>
